<compile_context>
chip_gen: v6e
topology: v6e:2x2x1
jax: 0.10.0
libtpu: 0.0.40
codegen_flags: <defaults>
</compile_context>

<pallas_src>
import functools

import jax
import jax.numpy as jnp
from jax.experimental import pallas as pl
from jax.experimental.pallas import tpu as pltpu

_LANE = 128
_SUBLANE = 8
_MAX_COLS = 2048
_TARGET_BLOCK_BYTES = 8 * 1024 * 1024  # per-operand block; x2 operands x2 buffers = 32 MiB


def _sublane_multiple(dtype) -> int:
    # Sub-32-bit dtypes pack along sublanes: bf16 vreg = [16,128], int8/fp8 = [32,128].
    itemsize = jnp.dtype(dtype).itemsize
    return _SUBLANE * max(1, 4 // max(1, itemsize))


def _round_up(x: int, m: int) -> int:
    return ((x + m - 1) // m) * m


def _pick_cols(total: int) -> int:
    """Largest multiple of 128 (<= _MAX_COLS) that divides `total`; 0 if none."""
    best = 0
    c = _LANE
    limit = min(_MAX_COLS, total)
    while c <= limit:
        if total % c == 0:
            best = c
        c += _LANE
    return best


def _mse_partial_kernel(x_ref, t_ref, p_ref):
    # x_ref / t_ref: (tile_rows, cols) lane-dense VMEM tiles.  Per-block partial
    # sum reduced over the sublane axis only; the lane axis stays vector-shaped
    # so the steady-state VPU work hides under the input DMAs.
    d = x_ref[...].astype(jnp.float32) - t_ref[...].astype(jnp.float32)
    p_ref[...] = jnp.sum(d * d, axis=0, keepdims=True)


def _mse_partial_kernel_masked(x_ref, t_ref, p_ref, *, rows_total):
    # Same as above, but the LAST grid block overhangs the real row extent:
    # mask out-of-range rows (garbage VMEM) with a row-index select.
    d = x_ref[...].astype(jnp.float32) - t_ref[...].astype(jnp.float32)
    sq = d * d
    i = pl.program_id(0)
    last = pl.num_programs(0) - 1
    tile_rows = x_ref.shape[0]

    @pl.when(i < last)
    def _():
        p_ref[...] = jnp.sum(sq, axis=0, keepdims=True)

    @pl.when(i == last)
    def _():
        row_ids = last * tile_rows + jax.lax.broadcasted_iota(jnp.int32, sq.shape, 0)
        masked = jnp.where(row_ids < rows_total, sq, 0.0)
        p_ref[...] = jnp.sum(masked, axis=0, keepdims=True)


def mse_loss(inputs, targets):
    """Pallas implementation of the module's forward (see layout comment above)."""
    assert inputs.shape == targets.shape
    assert inputs.ndim >= 2
    shape = inputs.shape
    total = 1
    for s in shape:
        total *= int(s)
    channels = int(shape[1])
    # mean over non-channel positions of the channel-sum == sum_all / (total / C)
    inv_denom = float(channels) / float(total)

    itemsize = jnp.dtype(inputs.dtype).itemsize
    sub = _sublane_multiple(inputs.dtype)

    cols = _pick_cols(total)
    if cols:
        # Exact lane-dense retile: reshape of the contiguous buffer is free (no copy).
        rows = total // cols
        x2 = inputs.reshape(rows, cols)
        t2 = targets.reshape(rows, cols)
    else:
        # Rare fallback: total not divisible by 128 — minimal zero pad of both
        # operands (padded diff == 0, exact).
        # TODO(synk): replace with an in-kernel flat-index mask to avoid the pad copy.
        cols = _LANE
        rows = pl.cdiv(total, cols)
        pad = rows * cols - total
        x2 = jnp.pad(inputs.reshape(-1), (0, pad)).reshape(rows, cols)
        t2 = jnp.pad(targets.reshape(-1), (0, pad)).reshape(rows, cols)

    # Block rows: ~8 MiB per operand, capped so grid >= 2 when possible so the
    # "parallel" grid axis shards across v7x's two TensorCores.
    target_rows = max(sub, (_TARGET_BLOCK_BYTES // (cols * itemsize)) // sub * sub)
    half_rows = _round_up(pl.cdiv(rows, 2), sub)
    tile_rows = min(target_rows, half_rows)
    if tile_rows >= rows:
        tile_rows = rows  # single full-extent block: always a legal block shape, no masking
    grid = pl.cdiv(rows, tile_rows)

    if rows % tile_rows == 0:
        kernel = _mse_partial_kernel
    else:
        kernel = functools.partial(_mse_partial_kernel_masked, rows_total=rows)

    # VMEM limit from the actual footprint: 2 inputs x 2 buffers x tile, plus
    # double-buffered output row and slack.
    tile_bytes = tile_rows * cols * itemsize
    vmem_limit = 2 * 2 * tile_bytes + 2 * cols * 4 + (4 << 20)
    vmem_limit = int(min(96 << 20, max(8 << 20, vmem_limit)))

    cost = pl.CostEstimate(
        flops=3 * total,
        transcendentals=0,
        bytes_accessed=2 * total * itemsize + grid * cols * 4,
    )

    partials = pl.pallas_call(
        kernel,
        out_shape=jax.ShapeDtypeStruct((grid, cols), jnp.float32),
        grid_spec=pltpu.PrefetchScalarGridSpec(
            num_scalar_prefetch=0,
            grid=(grid,),
            in_specs=[
                pl.BlockSpec((tile_rows, cols), lambda i: (i, 0)),
                pl.BlockSpec((tile_rows, cols), lambda i: (i, 0)),
            ],
            out_specs=pl.BlockSpec((1, cols), lambda i: (i, 0)),
        ),
        compiler_params=pltpu.CompilerParams(
            dimension_semantics=("parallel",),  # independent partials -> both TCs on v7x
            vmem_limit_bytes=vmem_limit,
        ),
        cost_estimate=cost,
    )(x2, t2)

    # Tiny final cross-lane reduction + scale (one cheap XLA op on (grid, cols)).
    return jnp.sum(partials) * jnp.float32(inv_denom)


def _reference(inputs, targets):
    d = inputs.astype(jnp.float32) - targets.astype(jnp.float32)
    return jnp.mean(jnp.sum(d * d, axis=1))


if __name__ == "__main__":
    key = jax.random.PRNGKey(0)
    k1, k2, k3, k4 = jax.random.split(key, 4)

    # Small NCHW shape consistent with the module (grid==1 fast path).
    N, C, H, W = 2, 4, 16, 16
    x = jax.random.normal(k1, (N, C, H, W), dtype=jnp.float32)
    t = jax.random.normal(k2, (N, C, H, W), dtype=jnp.float32)
    loss = mse_loss(x, t)
    jax.block_until_ready(loss)
    ref = _reference(x, t)
    assert jnp.allclose(loss, ref, rtol=1e-5, atol=1e-5), (loss, ref)

    # Second small shape exercising the multi-block path with a masked ragged
    # last block (rows=9, tile_rows=8, grid=2).
    x2 = jax.random.normal(k3, (2, 4, 48, 48), dtype=jnp.float32)
    t2 = jax.random.normal(k4, (2, 4, 48, 48), dtype=jnp.float32)
    loss2 = mse_loss(x2, t2)
    jax.block_until_ready(loss2)
    ref2 = _reference(x2, t2)
    assert jnp.allclose(loss2, ref2, rtol=1e-5, atol=1e-5), (loss2, ref2)

    print("KERNEL_OK")
</pallas_src>

<mosaic_0001>
module attributes {stable_mosaic.version = 11 : i64} {
  func.func @_mse_partial_kernel(%arg0: i32, %arg1: memref<1x2048xf32, #tpu.memory_space<vmem>>, %arg2: memref<1x2048xf32, #tpu.memory_space<vmem>>, %arg3: memref<1x2048xf32, #tpu.memory_space<vmem>>) attributes {dimension_semantics = [#tpu.dimension_semantics<parallel>], iteration_bounds = array<i64: 1>, scalar_prefetch = 0 : i64, scratch_operands = 0 : i64, tpu.core_type = #tpu.core_type<tc>, window_params = [{transform_indices = @transform_0, window_bounds = array<i64: 1, 2048>}, {transform_indices = @transform_1, window_bounds = array<i64: 1, 2048>}, {transform_indices = @transform_2, window_bounds = array<i64: 1, 2048>}]} {
    %c0 = arith.constant 0 : index
    %c0_0 = arith.constant 0 : index
    %0 = vector.load %arg1[%c0, %c0_0] : memref<1x2048xf32, #tpu.memory_space<vmem>>, vector<1x2048xf32>
    %c0_1 = arith.constant 0 : index
    %c0_2 = arith.constant 0 : index
    %1 = vector.load %arg2[%c0_1, %c0_2] : memref<1x2048xf32, #tpu.memory_space<vmem>>, vector<1x2048xf32>
    %2 = arith.subf %0, %1 : vector<1x2048xf32>
    %3 = arith.mulf %2, %2 : vector<1x2048xf32>
    %cst = arith.constant dense<0.000000e+00> : vector<2048xf32>
    %4 = vector.multi_reduction <add>, %3, %cst [0] : vector<1x2048xf32> to vector<2048xf32>
    %5 = vector.shape_cast %4 : vector<2048xf32> to vector<1x2048xf32>
    %c0_3 = arith.constant 0 : index
    %c0_4 = arith.constant 0 : index
    %6 = vector.load %arg3[%c0_3, %c0_4] : memref<1x2048xf32, #tpu.memory_space<vmem>>, vector<1x2048xf32>
    tpu.vector_store %arg3[%c0_3, %c0_4], %5 {strides = array<i32>} : memref<1x2048xf32, #tpu.memory_space<vmem>>, vector<1x2048xf32>,
    return
  }
  func.func @transform_0(%arg0: i32) -> (i32, i32) {
    %c0_i32 = arith.constant 0 : i32
    %c0_i32_0 = arith.constant 0 : i32
    return %arg0, %c0_i32 : i32, i32
  }
  func.func @transform_1(%arg0: i32) -> (i32, i32) {
    %c0_i32 = arith.constant 0 : i32
    %c0_i32_0 = arith.constant 0 : i32
    return %arg0, %c0_i32 : i32, i32
  }
  func.func @transform_2(%arg0: i32) -> (i32, i32) {
    %c0_i32 = arith.constant 0 : i32
    %c0_i32_0 = arith.constant 0 : i32
    return %arg0, %c0_i32 : i32, i32
  }
}

</mosaic_0001>

<bundles_post_ra>
// kernel: tpu_custom_call.1
= control target key start
LH: loop header
LB: loop body
LE: loop exit
PB: predicated region body
PF: predicated region fallthrough
CT: control target
= control target key end

     0   :  { %7 = vsyncpa [#allocation3], 0  ;;  %s160_s0 = inlined_call_operand.hbm [shape: f32[1,2048], index: 0, kind: input, shape index: {}]   ;;  %s161_s1 = inlined_call_operand.hbm [shape: f32[1,2048], index: 1, kind: input, shape index: {}]   ;;  %s162_s2 = inlined_call_operand.hbm [shape: f32[1,2048], index: 2, kind: output, shape index: {}]  }
   0x1   :  { %8 = vsyncpa [#allocation6], 0 }
   0x2   :  { %9 = vsyncpa [#allocation4], 0  ;;  %s133_s9 = smov [#allocation2]   ;;  %s134_s11 = smov [#allocation5]  }
   0x3   :  { %s16_s10 = sshll.u32 %s133_s9, 4  ;;  %s26_s12 = sshll.u32 %s134_s11, 4  ;;  %s17_s10 = int_to_ptr.vmem [resolvable:$true] %s16_s10  ;;  %s27_s12 = int_to_ptr.vmem [resolvable:$true] %s26_s12 }
   0x4   :  { %s75_s13 = scalar_lea.vmem %s17_s10, 256  ;;  %p80_p1 = scmp.lt.s32.totalorder %s17_s10, %s17_s10 }
   0x5   :  { %p76_p0 = scmp.ne.s32.totalorder %s17_s10, %s75_s13  ;;  %p81_p2 = scmp.lt.s32.totalorder %s75_s13, %s75_s13 }
   0x7   :  { %p82_p3 = por %p81_p2, %p80_p1 }
   0x9   :  { %p83_p4 = pnand %p82_p3, %p76_p0 }
   0xb   :  { %86 = shalt.err (!%p83_p4)
}
   0xc   :  { %19 = dma.hbm_to_vmem [thread:$0]  %s160_s0, 256, %s17_s10, [#allocation3]  }
   0xd   :  { %s95_s16 = scalar_lea.vmem %s27_s12, 256  ;;  %p100_p6 = scmp.lt.s32.totalorder %s27_s12, %s27_s12 }
   0xe   :  { %p96_p5 = scmp.ne.s32.totalorder %s27_s12, %s95_s16  ;;  %p101_p7 = scmp.lt.s32.totalorder %s95_s16, %s95_s16 }
  0x10   :  { %p102_p8 = por %p101_p7, %p100_p6 }
  0x12   :  { %p103_p9 = pnand %p102_p8, %p96_p5 }
  0x14   :  { %106 = shalt.err (!%p103_p9)
}
  0x15   :  { %29 = dma.hbm_to_vmem [thread:$0]  %s161_s1, 256, %s27_s12, [#allocation6]  }
  0x16   :  { %127 = dma.done.wait [#allocation3], 256  }
  0x17   :  { %128 = vsyncadd [#allocation3], 4294967040 }
  0x18   :  { %129 = dma.done.wait [#allocation6], 256  }
  0x19   :  { %130 = vsyncadd [#allocation6], 4294967040  ;;  %v36_v0 = vld [vmem:[#allocation2] sm:$0xff]  ;;  %v38_v1 = vld [vmem:[#allocation5] sm:$0xff]  ;;  %s135_s0 = smov [#allocation7]  }
  0x1a   :  { %v37_v2 = vld [vmem:[#allocation2 + $0x8] sm:$0xff]  ;;  %v40_v3 = vsub.f32 %v36_v0, %v38_v1  ;;  %v39_v4 = vld [vmem:[#allocation5 + $0x8] sm:$0xff]  ;;  %s54_s19 = sshll.u32 %s135_s0, 4  ;;  %s55_s19 = int_to_ptr.vmem [resolvable:$true] %s54_s19 }
  0x1b   :  { %v41_v5 = vsub.f32 %v37_v2, %v39_v4  ;;  %s107_s20 = scalar_lea.vmem %s55_s19, 256  ;;  %p112_p11 = scmp.lt.s32.totalorder %s55_s19, %s55_s19 }
  0x1c   :  { %v42_v6 = vmul.f32 %v40_v3, %v40_v3  ;;  %p108_p10 = scmp.ne.s32.totalorder %s55_s19, %s107_s20  ;;  %p113_p12 = scmp.lt.s32.totalorder %s107_s20, %s107_s20 }
  0x1d   :  { %v43_v7 = vmul.f32 %v41_v5, %v41_v5 }
  0x1e   :  { %46 = vst [vmem:[#allocation7] sm:$0xff] %v42_v6  ;;  %p114_p13 = por %p113_p12, %p112_p11 }
  0x1f   :  { %47 = vst [vmem:[#allocation7 + $0x8] sm:$0xff] %v43_v7 }
  0x20   :  { %p115_p0 = pnand %p114_p13, %p108_p10 }
  0x22   :  { %118 = shalt.err (!%p115_p0)
}
  0x23   :  { %57 = dma.vmem_to_hbm [thread:$0]  %s55_s19, 256, %s162_s2, [#allocation4]  }
  0x24   :  { %131 = dma.done.wait [#allocation4], 256  }
  0x25   :  { %132 = vsyncadd [#allocation4], 4294967040 }
  0x26   :  { %61 = vsyncpa [#allocation3], 1 }
  0x27   :  { %62 = vsyncpa [#allocation6], 1 }
  0x28   :  { %63 = vsyncpa [#allocation4], 1 }

</bundles_post_ra>
